<compile_context>
chip_gen: v6e
topology: v6e:2x2x1
jax: 0.10.0
libtpu: 0.0.40
codegen_flags: <defaults>
</compile_context>

<pallas_src>
import math
import numpy as np
import jax
import jax.numpy as jnp
from jax.experimental import pallas as pl
from jax.experimental.pallas import tpu as pltpu


# ---------------------------------------------------------------------------
# Kernel
# ---------------------------------------------------------------------------
def _make_mha_kernel(heads, d_k, compute_dtype):
    scale = 1.0 / math.sqrt(d_k)
    f32 = jnp.float32
    cd = compute_dtype

    def kernel(q_ref, k_ref, v_ref,
               wq_ref, bq_ref, wk_ref, bk_ref, wv_ref, bv_ref,
               wo_ref, bo_ref,
               o_ref, s_ref):
        Bt, Sq, D = q_ref.shape
        Sk = k_ref.shape[1]

        # Fold the batch tile into the row dimension so every projection is a
        # single full-width matmul (MXU N = D, M = Bt*S).
        # NOTE: when Sq/Sk % 8 != 0 this reshape may materialize a VMEM copy;
        # correctness is unaffected.
        q2 = q_ref[...].reshape(Bt * Sq, D).astype(cd)
        k2 = k_ref[...].reshape(Bt * Sk, D).astype(cd)
        v2 = v_ref[...].reshape(Bt * Sk, D).astype(cd)

        # Full-width projections, hoisted out of the head loop (weights are
        # pre-transposed + pre-cast host-side; biases added in f32).
        qp = jnp.dot(q2, wq_ref[...], preferred_element_type=f32) + bq_ref[...]
        kp = jnp.dot(k2, wk_ref[...], preferred_element_type=f32) + bk_ref[...]
        vp = jnp.dot(v2, wv_ref[...], preferred_element_type=f32) + bv_ref[...]

        ctx_cols = []
        for h in range(heads):                 # static unroll: all slices static
            sl = slice(h * d_k, (h + 1) * d_k)
            qh = qp[:, sl].reshape(Bt, Sq, d_k).astype(cd)
            kh = kp[:, sl].reshape(Bt, Sk, d_k).astype(cd)
            vh = vp[:, sl].reshape(Bt, Sk, d_k).astype(cd)

            # Scaled dot-product attention for this head (all Bt rows at once).
            s = jnp.einsum("bqd,bkd->bqk", qh, kh,
                           preferred_element_type=f32) * scale
            # TODO(synk): mask path (masked_fill with -1e9) not implemented;
            # forward assumes mask=None as in the default call signature.
            s = s - jnp.max(s, axis=-1, keepdims=True)
            e = jnp.exp(s)
            denom = jnp.sum(e, axis=-1, keepdims=True)
            r = pl.reciprocal(denom, approx=True)   # EUP slot
            r = r * (2.0 - denom * r)               # one Newton step -> f32 acc.
            p = e * r
            # TODO(synk): nn.Dropout(0.1) is identity in eval mode; not applied.

            # Store this head's softmaxed scores (self.scores) in one write.
            # TODO(synk): for Sk < 128 this store is a masked partial vst; a
            # lane-padded / repacked scores layout would make it dense.
            s_ref[:, h, :, :] = p.astype(s_ref.dtype)

            ctx = jnp.einsum("bqk,bkd->bqd", p.astype(cd), vh,
                             preferred_element_type=f32)
            ctx_cols.append(ctx.reshape(Bt * Sq, d_k))

        # Concatenate heads and do ONE full-width, full-depth output projection
        # (contraction = D instead of d_k per head).
        concat = jnp.concatenate(ctx_cols, axis=1).astype(cd)   # (Bt*Sq, D)
        out = jnp.dot(concat, wo_ref[...], preferred_element_type=f32) \
            + bo_ref[...]
        o_ref[...] = out.reshape(Bt, Sq, D).astype(o_ref.dtype)

    return kernel


# ---------------------------------------------------------------------------
# Tiling heuristics (generation-aware)
# ---------------------------------------------------------------------------
def _tpu_vmem_capacity_bytes(default=128 * 1024 * 1024):
    try:
        info = pltpu.get_tpu_info()
        cap = getattr(info, "vmem_capacity_bytes", None)
        if cap:
            return int(cap)
    except Exception:
        pass
    return default


def _pick_batch_tile(B, Sq, Sk, D, H, *, scores_itemsize=4, w_itemsize=4,
                     target_rows=512):
    """Largest divisor of B that keeps matmul rows large while fitting VMEM.

    Budget is derived from the chip's VMEM capacity (v7x has 64 MiB vs
    128 MiB on v5e/v6e). Bt is capped so B//Bt >= 2, keeping the (only)
    parallel grid axis long enough for the second TensorCore on v7x.
    """
    vmem_cap = _tpu_vmem_capacity_bytes()
    budget = vmem_cap // 2          # leave headroom for compiler scratch/spills

    # Weights + biases, conservatively counted double-buffered.
    weights = 4 * D * D * w_itemsize * 2 + 4 * D * 4 * 2

    def footprint(bt):
        io = bt * (Sq + 2 * Sk) * D * 4 * 2             # q/k/v blocks (dbl-buf)
        outb = bt * Sq * D * 4 * 2                      # output block
        sc = bt * H * Sq * Sk * scores_itemsize * 2     # scores block
        live = 5 * bt * max(Sq, Sk) * D * 4             # projections + ctx values
        return weights + io + outb + sc + live

    max_bt = max(1, B // 2)         # keep >= 2 batch-tile steps (v7x: 2 TCs)
    best = 1
    for cand in range(1, max_bt + 1):
        if B % cand:
            continue
        if footprint(cand) > budget:
            continue
        if cand * Sq <= target_rows or cand == 1:
            best = cand
    return best


# ---------------------------------------------------------------------------
# Wrapper
# ---------------------------------------------------------------------------
def multi_head_attention(q, k, v, params, heads, *, batch_tile=None,
                         compute_dtype=jnp.float32,
                         scores_dtype=jnp.float32):
    """q: (B, Sq, D), k/v: (B, Sk, D). params: nn.Linear-style (D, D) weights
    and (1, D) biases. Returns (output (B, Sq, D), scores (B, H, Sq, Sk))."""
    B, Sq, D = q.shape
    Sk = k.shape[1]
    assert D % heads == 0, "d_model must be divisible by heads"
    d_k = D // heads

    if batch_tile is None:
        batch_tile = _pick_batch_tile(
            B, Sq, Sk, D, heads,
            scores_itemsize=np.dtype(scores_dtype).itemsize,
            w_itemsize=np.dtype(compute_dtype).itemsize)
    Bt = batch_tile
    assert B % Bt == 0

    # Host-side weight prep (runs once under jit): transpose nn.Linear weights
    # and cast to the MXU compute dtype; biases stay f32 (added post-matmul).
    cd = compute_dtype
    wqT = params["wq"].T.astype(cd)
    wkT = params["wk"].T.astype(cd)
    wvT = params["wv"].T.astype(cd)
    woT = params["wo"].T.astype(cd)
    bq = params["bq"].astype(jnp.float32)
    bk = params["bk"].astype(jnp.float32)
    bv = params["bv"].astype(jnp.float32)
    bo = params["bo"].astype(jnp.float32)

    qkv_spec = lambda S: pl.BlockSpec((Bt, S, D), lambda b: (b, 0, 0))
    w_spec = pl.BlockSpec((D, D), lambda b: (0, 0))   # constant index -> resident
    b_spec = pl.BlockSpec((1, D), lambda b: (0, 0))

    vmem_limit = int(_tpu_vmem_capacity_bytes() * 3 // 4)

    out, scores = pl.pallas_call(
        _make_mha_kernel(heads, d_k, cd),
        out_shape=(
            jax.ShapeDtypeStruct((B, Sq, D), q.dtype),
            jax.ShapeDtypeStruct((B, heads, Sq, Sk), scores_dtype),
        ),
        grid_spec=pltpu.PrefetchScalarGridSpec(
            num_scalar_prefetch=0,
            grid=(B // Bt,),
            in_specs=[
                qkv_spec(Sq),            # q
                qkv_spec(Sk),            # k
                qkv_spec(Sk),            # v
                w_spec, b_spec,          # q_linear
                w_spec, b_spec,          # k_linear
                w_spec, b_spec,          # v_linear
                w_spec, b_spec,          # out projection
            ],
            out_specs=[
                pl.BlockSpec((Bt, Sq, D), lambda b: (b, 0, 0)),
                pl.BlockSpec((Bt, heads, Sq, Sk), lambda b: (b, 0, 0, 0)),
            ],
        ),
        compiler_params=pltpu.CompilerParams(
            dimension_semantics=("parallel",),
            vmem_limit_bytes=vmem_limit),
    )(q, k, v, wqT, bq, wkT, bk, wvT, bv, woT, bo)
    return out, scores


# ---------------------------------------------------------------------------
# Pure-JAX reference (mirrors the PyTorch module: mask=None, eval mode)
# ---------------------------------------------------------------------------
def _reference_mha(q, k, v, params, heads):
    B, Sq, D = q.shape
    d_k = D // heads
    lin = lambda x, w, b: jnp.einsum("bsd,ed->bse", x, w) + b[0]
    qp = lin(q, params["wq"], params["bq"]).reshape(B, Sq, heads, d_k).transpose(0, 2, 1, 3)
    kp = lin(k, params["wk"], params["bk"]).reshape(B, -1, heads, d_k).transpose(0, 2, 1, 3)
    vp = lin(v, params["wv"], params["bv"]).reshape(B, -1, heads, d_k).transpose(0, 2, 1, 3)
    scores = jnp.einsum("bhqd,bhkd->bhqk", qp, kp) / math.sqrt(d_k)
    p = jax.nn.softmax(scores, axis=-1)
    o = jnp.einsum("bhqk,bhkd->bhqd", p, vp).transpose(0, 2, 1, 3).reshape(B, Sq, D)
    out = jnp.einsum("bsd,ed->bse", o, params["wo"]) + params["bo"][0]
    return out, p


if __name__ == "__main__":
    B, Sq, Sk, D, H = 2, 8, 8, 32, 4

    key = jax.random.PRNGKey(0)
    keys = jax.random.split(key, 12)
    bound = 1.0 / math.sqrt(D)   # PyTorch nn.Linear default init range

    params = {
        "wq": jax.random.uniform(keys[0], (D, D), jnp.float32, -bound, bound),
        "bq": jax.random.uniform(keys[1], (1, D), jnp.float32, -bound, bound),
        "wk": jax.random.uniform(keys[2], (D, D), jnp.float32, -bound, bound),
        "bk": jax.random.uniform(keys[3], (1, D), jnp.float32, -bound, bound),
        "wv": jax.random.uniform(keys[4], (D, D), jnp.float32, -bound, bound),
        "bv": jax.random.uniform(keys[5], (1, D), jnp.float32, -bound, bound),
        "wo": jax.random.uniform(keys[6], (D, D), jnp.float32, -bound, bound),
        "bo": jax.random.uniform(keys[7], (1, D), jnp.float32, -bound, bound),
    }

    q = jax.random.normal(keys[8], (B, Sq, D), jnp.float32)
    k = jax.random.normal(keys[9], (B, Sk, D), jnp.float32)
    v = jax.random.normal(keys[10], (B, Sk, D), jnp.float32)

    ref_out, ref_scores = _reference_mha(q, k, v, params, H)

    # Exact (f32) path: strict check against the PyTorch-equivalent reference.
    out, scores = multi_head_attention(q, k, v, params, H)
    jax.block_until_ready(out)
    jax.block_until_ready(scores)
    assert out.shape == (B, Sq, D) and scores.shape == (B, H, Sq, Sk)
    assert jnp.allclose(out, ref_out, atol=1e-4, rtol=1e-4)
    assert jnp.allclose(scores, ref_scores, atol=1e-4, rtol=1e-4)

    # Fast path: bf16 MXU operands (f32 accumulation + f32 softmax) and bf16
    # scores writeback; smoke-checked against the f32 reference.
    out_bf, scores_bf = multi_head_attention(
        q, k, v, params, H,
        compute_dtype=jnp.bfloat16, scores_dtype=jnp.bfloat16)
    jax.block_until_ready(out_bf)
    jax.block_until_ready(scores_bf)
    assert jnp.allclose(out_bf, ref_out, atol=1e-1, rtol=1e-1)
    assert jnp.allclose(scores_bf.astype(jnp.float32), ref_scores,
                        atol=1e-1, rtol=1e-1)

    print("KERNEL_OK")
</pallas_src>

<mosaic_0001>
module attributes {stable_mosaic.version = 11 : i64} {
  func.func @kernel(%arg0: i32, %arg1: memref<1x8x32xf32, #tpu.memory_space<vmem>>, %arg2: memref<1x8x32xf32, #tpu.memory_space<vmem>>, %arg3: memref<1x8x32xf32, #tpu.memory_space<vmem>>, %arg4: memref<32x32xf32, #tpu.memory_space<vmem>>, %arg5: memref<1x32xf32, #tpu.memory_space<vmem>>, %arg6: memref<32x32xf32, #tpu.memory_space<vmem>>, %arg7: memref<1x32xf32, #tpu.memory_space<vmem>>, %arg8: memref<32x32xf32, #tpu.memory_space<vmem>>, %arg9: memref<1x32xf32, #tpu.memory_space<vmem>>, %arg10: memref<32x32xf32, #tpu.memory_space<vmem>>, %arg11: memref<1x32xf32, #tpu.memory_space<vmem>>, %arg12: memref<1x8x32xf32, #tpu.memory_space<vmem>>, %arg13: memref<1x4x8x8xf32, #tpu.memory_space<vmem>>) attributes {dimension_semantics = [#tpu.dimension_semantics<parallel>], iteration_bounds = array<i64: 2>, scalar_prefetch = 0 : i64, scratch_operands = 0 : i64, tpu.core_type = #tpu.core_type<tc>, window_params = [{transform_indices = @transform_0, window_bounds = array<i64: 1, 8, 32>}, {transform_indices = @transform_1, window_bounds = array<i64: 1, 8, 32>}, {transform_indices = @transform_2, window_bounds = array<i64: 1, 8, 32>}, {pipeline_mode = #tpu.pipeline_mode<synchronous>, transform_indices = @transform_3, window_bounds = array<i64: 32, 32>}, {pipeline_mode = #tpu.pipeline_mode<synchronous>, transform_indices = @transform_4, window_bounds = array<i64: 1, 32>}, {pipeline_mode = #tpu.pipeline_mode<synchronous>, transform_indices = @transform_5, window_bounds = array<i64: 32, 32>}, {pipeline_mode = #tpu.pipeline_mode<synchronous>, transform_indices = @transform_6, window_bounds = array<i64: 1, 32>}, {pipeline_mode = #tpu.pipeline_mode<synchronous>, transform_indices = @transform_7, window_bounds = array<i64: 32, 32>}, {pipeline_mode = #tpu.pipeline_mode<synchronous>, transform_indices = @transform_8, window_bounds = array<i64: 1, 32>}, {pipeline_mode = #tpu.pipeline_mode<synchronous>, transform_indices = @transform_9, window_bounds = array<i64: 32, 32>}, {pipeline_mode = #tpu.pipeline_mode<synchronous>, transform_indices = @transform_10, window_bounds = array<i64: 1, 32>}, {transform_indices = @transform_11, window_bounds = array<i64: 1, 8, 32>}, {transform_indices = @transform_12, window_bounds = array<i64: 1, 4, 8, 8>}]} {
    %c0 = arith.constant 0 : index
    %c0_0 = arith.constant 0 : index
    %c0_1 = arith.constant 0 : index
    %0 = vector.load %arg1[%c0, %c0_0, %c0_1] : memref<1x8x32xf32, #tpu.memory_space<vmem>>, vector<1x8x32xf32>
    %1 = vector.shape_cast %0 : vector<1x8x32xf32> to vector<8x32xf32>
    %c0_2 = arith.constant 0 : index
    %c0_3 = arith.constant 0 : index
    %c0_4 = arith.constant 0 : index
    %2 = vector.load %arg2[%c0_2, %c0_3, %c0_4] : memref<1x8x32xf32, #tpu.memory_space<vmem>>, vector<1x8x32xf32>
    %3 = vector.shape_cast %2 : vector<1x8x32xf32> to vector<8x32xf32>
    %c0_5 = arith.constant 0 : index
    %c0_6 = arith.constant 0 : index
    %c0_7 = arith.constant 0 : index
    %4 = vector.load %arg3[%c0_5, %c0_6, %c0_7] : memref<1x8x32xf32, #tpu.memory_space<vmem>>, vector<1x8x32xf32>
    %5 = vector.shape_cast %4 : vector<1x8x32xf32> to vector<8x32xf32>
    %c0_8 = arith.constant 0 : index
    %c0_9 = arith.constant 0 : index
    %6 = vector.load %arg4[%c0_8, %c0_9] : memref<32x32xf32, #tpu.memory_space<vmem>>, vector<32x32xf32>
    %cst = arith.constant dense<0.000000e+00> : vector<8x32xf32>
    %7 = tpu.matmul %1, %6, %cst {dimension_numbers = #tpu.dot_dimension_numbers<[1], [0], [0], [1], [0, 0, 1, 1], [], []>} : vector<8x32xf32>, vector<32x32xf32>, vector<8x32xf32> -> vector<8x32xf32>
    %c0_10 = arith.constant 0 : index
    %c0_11 = arith.constant 0 : index
    %8 = vector.load %arg5[%c0_10, %c0_11] : memref<1x32xf32, #tpu.memory_space<vmem>>, vector<1x32xf32>
    %9 = vector.broadcast %8 : vector<1x32xf32> to vector<8x32xf32>
    %10 = arith.addf %7, %9 : vector<8x32xf32>
    %c0_12 = arith.constant 0 : index
    %c0_13 = arith.constant 0 : index
    %11 = vector.load %arg6[%c0_12, %c0_13] : memref<32x32xf32, #tpu.memory_space<vmem>>, vector<32x32xf32>
    %cst_14 = arith.constant dense<0.000000e+00> : vector<8x32xf32>
    %12 = tpu.matmul %3, %11, %cst_14 {dimension_numbers = #tpu.dot_dimension_numbers<[1], [0], [0], [1], [0, 0, 1, 1], [], []>} : vector<8x32xf32>, vector<32x32xf32>, vector<8x32xf32> -> vector<8x32xf32>
    %c0_15 = arith.constant 0 : index
    %c0_16 = arith.constant 0 : index
    %13 = vector.load %arg7[%c0_15, %c0_16] : memref<1x32xf32, #tpu.memory_space<vmem>>, vector<1x32xf32>
    %14 = vector.broadcast %13 : vector<1x32xf32> to vector<8x32xf32>
    %15 = arith.addf %12, %14 : vector<8x32xf32>
    %c0_17 = arith.constant 0 : index
    %c0_18 = arith.constant 0 : index
    %16 = vector.load %arg8[%c0_17, %c0_18] : memref<32x32xf32, #tpu.memory_space<vmem>>, vector<32x32xf32>
    %cst_19 = arith.constant dense<0.000000e+00> : vector<8x32xf32>
    %17 = tpu.matmul %5, %16, %cst_19 {dimension_numbers = #tpu.dot_dimension_numbers<[1], [0], [0], [1], [0, 0, 1, 1], [], []>} : vector<8x32xf32>, vector<32x32xf32>, vector<8x32xf32> -> vector<8x32xf32>
    %c0_20 = arith.constant 0 : index
    %c0_21 = arith.constant 0 : index
    %18 = vector.load %arg9[%c0_20, %c0_21] : memref<1x32xf32, #tpu.memory_space<vmem>>, vector<1x32xf32>
    %19 = vector.broadcast %18 : vector<1x32xf32> to vector<8x32xf32>
    %20 = arith.addf %17, %19 : vector<8x32xf32>
    %21 = vector.extract_strided_slice %10 {offsets = [0, 0], sizes = [8, 8], strides = [1, 1]} : vector<8x32xf32> to vector<8x8xf32>
    %22 = vector.shape_cast %21 : vector<8x8xf32> to vector<1x8x8xf32>
    %23 = vector.extract_strided_slice %15 {offsets = [0, 0], sizes = [8, 8], strides = [1, 1]} : vector<8x32xf32> to vector<8x8xf32>
    %24 = vector.shape_cast %23 : vector<8x8xf32> to vector<1x8x8xf32>
    %25 = vector.extract_strided_slice %20 {offsets = [0, 0], sizes = [8, 8], strides = [1, 1]} : vector<8x32xf32> to vector<8x8xf32>
    %26 = vector.shape_cast %25 : vector<8x8xf32> to vector<1x8x8xf32>
    "tpu.trace_start"() <{level = 10 : i32, message = "bqd,bkd->bqk"}> : () -> ()
    %cst_22 = arith.constant dense<0.000000e+00> : vector<1x8x8xf32>
    %27 = tpu.matmul %22, %24, %cst_22 {dimension_numbers = #tpu.dot_dimension_numbers<[2], [2], [1], [1], [0, 0, 0, 1, 1, 1], [0], [0]>} : vector<1x8x8xf32>, vector<1x8x8xf32>, vector<1x8x8xf32> -> vector<1x8x8xf32>
    "tpu.trace_stop"() : () -> ()
    %cst_23 = arith.constant 0.353553385 : f32
    %28 = vector.broadcast %cst_23 : f32 to vector<1x8x8xf32>
    %29 = arith.mulf %27, %28 : vector<1x8x8xf32>
    %cst_24 = arith.constant dense<0xFF800000> : vector<1x8xf32>
    %30 = vector.multi_reduction <maximumf>, %29, %cst_24 [2] : vector<1x8x8xf32> to vector<1x8xf32>
    %31 = vector.shape_cast %30 : vector<1x8xf32> to vector<1x8x1xf32>
    %32 = vector.broadcast %31 : vector<1x8x1xf32> to vector<1x8x8xf32>
    %33 = arith.subf %29, %32 : vector<1x8x8xf32>
    %34 = math.exp %33 : vector<1x8x8xf32>
    %cst_25 = arith.constant dense<0.000000e+00> : vector<1x8xf32>
    %35 = vector.multi_reduction <add>, %34, %cst_25 [2] : vector<1x8x8xf32> to vector<1x8xf32>
    %36 = vector.shape_cast %35 : vector<1x8xf32> to vector<1x8x1xf32>
    %37 = tpu.reciprocal %36 {approx = true} : vector<1x8x1xf32> -> vector<1x8x1xf32>
    %38 = arith.mulf %36, %37 : vector<1x8x1xf32>
    %cst_26 = arith.constant 2.000000e+00 : f32
    %39 = vector.broadcast %cst_26 : f32 to vector<1x8x1xf32>
    %40 = arith.subf %39, %38 : vector<1x8x1xf32>
    %41 = arith.mulf %37, %40 : vector<1x8x1xf32>
    %42 = vector.broadcast %41 : vector<1x8x1xf32> to vector<1x8x8xf32>
    %43 = arith.mulf %34, %42 : vector<1x8x8xf32>
    %c0_27 = arith.constant 0 : index
    %c0_28 = arith.constant 0 : index
    %c0_29 = arith.constant 0 : index
    %c0_30 = arith.constant 0 : index
    %44 = vector.load %arg13[%c0_27, %c0_28, %c0_29, %c0_30] : memref<1x4x8x8xf32, #tpu.memory_space<vmem>>, vector<1x1x8x8xf32>
    %45 = vector.shape_cast %44 : vector<1x1x8x8xf32> to vector<1x8x8xf32>
    %46 = vector.shape_cast %43 : vector<1x8x8xf32> to vector<1x1x8x8xf32>
    tpu.vector_store %arg13[%c0_27, %c0_28, %c0_29, %c0_30], %46 {strides = array<i32>} : memref<1x4x8x8xf32, #tpu.memory_space<vmem>>, vector<1x1x8x8xf32>,
    "tpu.trace_start"() <{level = 10 : i32, message = "bqk,bkd->bqd"}> : () -> ()
    %cst_31 = arith.constant dense<0.000000e+00> : vector<1x8x8xf32>
    %47 = tpu.matmul %43, %26, %cst_31 {dimension_numbers = #tpu.dot_dimension_numbers<[2], [1], [1], [2], [0, 0, 0, 1, 1, 2], [0], [0]>} : vector<1x8x8xf32>, vector<1x8x8xf32>, vector<1x8x8xf32> -> vector<1x8x8xf32>
    "tpu.trace_stop"() : () -> ()
    %48 = vector.shape_cast %47 : vector<1x8x8xf32> to vector<8x8xf32>
    %49 = vector.extract_strided_slice %10 {offsets = [0, 8], sizes = [8, 8], strides = [1, 1]} : vector<8x32xf32> to vector<8x8xf32>
    %50 = vector.shape_cast %49 : vector<8x8xf32> to vector<1x8x8xf32>
    %51 = vector.extract_strided_slice %15 {offsets = [0, 8], sizes = [8, 8], strides = [1, 1]} : vector<8x32xf32> to vector<8x8xf32>
    %52 = vector.shape_cast %51 : vector<8x8xf32> to vector<1x8x8xf32>
    %53 = vector.extract_strided_slice %20 {offsets = [0, 8], sizes = [8, 8], strides = [1, 1]} : vector<8x32xf32> to vector<8x8xf32>
    %54 = vector.shape_cast %53 : vector<8x8xf32> to vector<1x8x8xf32>
    "tpu.trace_start"() <{level = 10 : i32, message = "bqd,bkd->bqk"}> : () -> ()
    %cst_32 = arith.constant dense<0.000000e+00> : vector<1x8x8xf32>
    %55 = tpu.matmul %50, %52, %cst_32 {dimension_numbers = #tpu.dot_dimension_numbers<[2], [2], [1], [1], [0, 0, 0, 1, 1, 1], [0], [0]>} : vector<1x8x8xf32>, vector<1x8x8xf32>, vector<1x8x8xf32> -> vector<1x8x8xf32>
    "tpu.trace_stop"() : () -> ()
    %cst_33 = arith.constant 0.353553385 : f32
    %56 = vector.broadcast %cst_33 : f32 to vector<1x8x8xf32>
    %57 = arith.mulf %55, %56 : vector<1x8x8xf32>
    %cst_34 = arith.constant dense<0xFF800000> : vector<1x8xf32>
    %58 = vector.multi_reduction <maximumf>, %57, %cst_34 [2] : vector<1x8x8xf32> to vector<1x8xf32>
    %59 = vector.shape_cast %58 : vector<1x8xf32> to vector<1x8x1xf32>
    %60 = vector.broadcast %59 : vector<1x8x1xf32> to vector<1x8x8xf32>
    %61 = arith.subf %57, %60 : vector<1x8x8xf32>
    %62 = math.exp %61 : vector<1x8x8xf32>
    %cst_35 = arith.constant dense<0.000000e+00> : vector<1x8xf32>
    %63 = vector.multi_reduction <add>, %62, %cst_35 [2] : vector<1x8x8xf32> to vector<1x8xf32>
    %64 = vector.shape_cast %63 : vector<1x8xf32> to vector<1x8x1xf32>
    %65 = tpu.reciprocal %64 {approx = true} : vector<1x8x1xf32> -> vector<1x8x1xf32>
    %66 = arith.mulf %64, %65 : vector<1x8x1xf32>
    %cst_36 = arith.constant 2.000000e+00 : f32
    %67 = vector.broadcast %cst_36 : f32 to vector<1x8x1xf32>
    %68 = arith.subf %67, %66 : vector<1x8x1xf32>
    %69 = arith.mulf %65, %68 : vector<1x8x1xf32>
    %70 = vector.broadcast %69 : vector<1x8x1xf32> to vector<1x8x8xf32>
    %71 = arith.mulf %62, %70 : vector<1x8x8xf32>
    %c0_37 = arith.constant 0 : index
    %c1 = arith.constant 1 : index
    %c0_38 = arith.constant 0 : index
    %c0_39 = arith.constant 0 : index
    %72 = vector.load %arg13[%c0_37, %c1, %c0_38, %c0_39] : memref<1x4x8x8xf32, #tpu.memory_space<vmem>>, vector<1x1x8x8xf32>
    %73 = vector.shape_cast %72 : vector<1x1x8x8xf32> to vector<1x8x8xf32>
    %74 = vector.shape_cast %71 : vector<1x8x8xf32> to vector<1x1x8x8xf32>
    tpu.vector_store %arg13[%c0_37, %c1, %c0_38, %c0_39], %74 {strides = array<i32>} : memref<1x4x8x8xf32, #tpu.memory_space<vmem>>, vector<1x1x8x8xf32>,
    "tpu.trace_start"() <{level = 10 : i32, message = "bqk,bkd->bqd"}> : () -> ()
    %cst_40 = arith.constant dense<0.000000e+00> : vector<1x8x8xf32>
    %75 = tpu.matmul %71, %54, %cst_40 {dimension_numbers = #tpu.dot_dimension_numbers<[2], [1], [1], [2], [0, 0, 0, 1, 1, 2], [0], [0]>} : vector<1x8x8xf32>, vector<1x8x8xf32>, vector<1x8x8xf32> -> vector<1x8x8xf32>
    "tpu.trace_stop"() : () -> ()
    %76 = vector.shape_cast %75 : vector<1x8x8xf32> to vector<8x8xf32>
    %77 = vector.extract_strided_slice %10 {offsets = [0, 16], sizes = [8, 8], strides = [1, 1]} : vector<8x32xf32> to vector<8x8xf32>
    %78 = vector.shape_cast %77 : vector<8x8xf32> to vector<1x8x8xf32>
    %79 = vector.extract_strided_slice %15 {offsets = [0, 16], sizes = [8, 8], strides = [1, 1]} : vector<8x32xf32> to vector<8x8xf32>
    %80 = vector.shape_cast %79 : vector<8x8xf32> to vector<1x8x8xf32>
    %81 = vector.extract_strided_slice %20 {offsets = [0, 16], sizes = [8, 8], strides = [1, 1]} : vector<8x32xf32> to vector<8x8xf32>
    %82 = vector.shape_cast %81 : vector<8x8xf32> to vector<1x8x8xf32>
    "tpu.trace_start"() <{level = 10 : i32, message = "bqd,bkd->bqk"}> : () -> ()
    %cst_41 = arith.constant dense<0.000000e+00> : vector<1x8x8xf32>
    %83 = tpu.matmul %78, %80, %cst_41 {dimension_numbers = #tpu.dot_dimension_numbers<[2], [2], [1], [1], [0, 0, 0, 1, 1, 1], [0], [0]>} : vector<1x8x8xf32>, vector<1x8x8xf32>, vector<1x8x8xf32> -> vector<1x8x8xf32>
    "tpu.trace_stop"() : () -> ()
    %cst_42 = arith.constant 0.353553385 : f32
    %84 = vector.broadcast %cst_42 : f32 to vector<1x8x8xf32>
    %85 = arith.mulf %83, %84 : vector<1x8x8xf32>
    %cst_43 = arith.constant dense<0xFF800000> : vector<1x8xf32>
    %86 = vector.multi_reduction <maximumf>, %85, %cst_43 [2] : vector<1x8x8xf32> to vector<1x8xf32>
    %87 = vector.shape_cast %86 : vector<1x8xf32> to vector<1x8x1xf32>
    %88 = vector.broadcast %87 : vector<1x8x1xf32> to vector<1x8x8xf32>
    %89 = arith.subf %85, %88 : vector<1x8x8xf32>
    %90 = math.exp %89 : vector<1x8x8xf32>
    %cst_44 = arith.constant dense<0.000000e+00> : vector<1x8xf32>
    %91 = vector.multi_reduction <add>, %90, %cst_44 [2] : vector<1x8x8xf32> to vector<1x8xf32>
    %92 = vector.shape_cast %91 : vector<1x8xf32> to vector<1x8x1xf32>
    %93 = tpu.reciprocal %92 {approx = true} : vector<1x8x1xf32> -> vector<1x8x1xf32>
    %94 = arith.mulf %92, %93 : vector<1x8x1xf32>
    %cst_45 = arith.constant 2.000000e+00 : f32
    %95 = vector.broadcast %cst_45 : f32 to vector<1x8x1xf32>
    %96 = arith.subf %95, %94 : vector<1x8x1xf32>
    %97 = arith.mulf %93, %96 : vector<1x8x1xf32>
    %98 = vector.broadcast %97 : vector<1x8x1xf32> to vector<1x8x8xf32>
    %99 = arith.mulf %90, %98 : vector<1x8x8xf32>
    %c0_46 = arith.constant 0 : index
    %c2 = arith.constant 2 : index
    %c0_47 = arith.constant 0 : index
    %c0_48 = arith.constant 0 : index
    %100 = vector.load %arg13[%c0_46, %c2, %c0_47, %c0_48] : memref<1x4x8x8xf32, #tpu.memory_space<vmem>>, vector<1x1x8x8xf32>
    %101 = vector.shape_cast %100 : vector<1x1x8x8xf32> to vector<1x8x8xf32>
    %102 = vector.shape_cast %99 : vector<1x8x8xf32> to vector<1x1x8x8xf32>
    tpu.vector_store %arg13[%c0_46, %c2, %c0_47, %c0_48], %102 {strides = array<i32>} : memref<1x4x8x8xf32, #tpu.memory_space<vmem>>, vector<1x1x8x8xf32>,
    "tpu.trace_start"() <{level = 10 : i32, message = "bqk,bkd->bqd"}> : () -> ()
    %cst_49 = arith.constant dense<0.000000e+00> : vector<1x8x8xf32>
    %103 = tpu.matmul %99, %82, %cst_49 {dimension_numbers = #tpu.dot_dimension_numbers<[2], [1], [1], [2], [0, 0, 0, 1, 1, 2], [0], [0]>} : vector<1x8x8xf32>, vector<1x8x8xf32>, vector<1x8x8xf32> -> vector<1x8x8xf32>
    "tpu.trace_stop"() : () -> ()
    %104 = vector.shape_cast %103 : vector<1x8x8xf32> to vector<8x8xf32>
    %105 = vector.extract_strided_slice %10 {offsets = [0, 24], sizes = [8, 8], strides = [1, 1]} : vector<8x32xf32> to vector<8x8xf32>
    %106 = vector.shape_cast %105 : vector<8x8xf32> to vector<1x8x8xf32>
    %107 = vector.extract_strided_slice %15 {offsets = [0, 24], sizes = [8, 8], strides = [1, 1]} : vector<8x32xf32> to vector<8x8xf32>
    %108 = vector.shape_cast %107 : vector<8x8xf32> to vector<1x8x8xf32>
    %109 = vector.extract_strided_slice %20 {offsets = [0, 24], sizes = [8, 8], strides = [1, 1]} : vector<8x32xf32> to vector<8x8xf32>
    %110 = vector.shape_cast %109 : vector<8x8xf32> to vector<1x8x8xf32>
    "tpu.trace_start"() <{level = 10 : i32, message = "bqd,bkd->bqk"}> : () -> ()
    %cst_50 = arith.constant dense<0.000000e+00> : vector<1x8x8xf32>
    %111 = tpu.matmul %106, %108, %cst_50 {dimension_numbers = #tpu.dot_dimension_numbers<[2], [2], [1], [1], [0, 0, 0, 1, 1, 1], [0], [0]>} : vector<1x8x8xf32>, vector<1x8x8xf32>, vector<1x8x8xf32> -> vector<1x8x8xf32>
    "tpu.trace_stop"() : () -> ()
    %cst_51 = arith.constant 0.353553385 : f32
    %112 = vector.broadcast %cst_51 : f32 to vector<1x8x8xf32>
    %113 = arith.mulf %111, %112 : vector<1x8x8xf32>
    %cst_52 = arith.constant dense<0xFF800000> : vector<1x8xf32>
    %114 = vector.multi_reduction <maximumf>, %113, %cst_52 [2] : vector<1x8x8xf32> to vector<1x8xf32>
    %115 = vector.shape_cast %114 : vector<1x8xf32> to vector<1x8x1xf32>
    %116 = vector.broadcast %115 : vector<1x8x1xf32> to vector<1x8x8xf32>
    %117 = arith.subf %113, %116 : vector<1x8x8xf32>
    %118 = math.exp %117 : vector<1x8x8xf32>
    %cst_53 = arith.constant dense<0.000000e+00> : vector<1x8xf32>
    %119 = vector.multi_reduction <add>, %118, %cst_53 [2] : vector<1x8x8xf32> to vector<1x8xf32>
    %120 = vector.shape_cast %119 : vector<1x8xf32> to vector<1x8x1xf32>
    %121 = tpu.reciprocal %120 {approx = true} : vector<1x8x1xf32> -> vector<1x8x1xf32>
    %122 = arith.mulf %120, %121 : vector<1x8x1xf32>
    %cst_54 = arith.constant 2.000000e+00 : f32
    %123 = vector.broadcast %cst_54 : f32 to vector<1x8x1xf32>
    %124 = arith.subf %123, %122 : vector<1x8x1xf32>
    %125 = arith.mulf %121, %124 : vector<1x8x1xf32>
    %126 = vector.broadcast %125 : vector<1x8x1xf32> to vector<1x8x8xf32>
    %127 = arith.mulf %118, %126 : vector<1x8x8xf32>
    %c0_55 = arith.constant 0 : index
    %c3 = arith.constant 3 : index
    %c0_56 = arith.constant 0 : index
    %c0_57 = arith.constant 0 : index
    %128 = vector.load %arg13[%c0_55, %c3, %c0_56, %c0_57] : memref<1x4x8x8xf32, #tpu.memory_space<vmem>>, vector<1x1x8x8xf32>
    %129 = vector.shape_cast %128 : vector<1x1x8x8xf32> to vector<1x8x8xf32>
    %130 = vector.shape_cast %127 : vector<1x8x8xf32> to vector<1x1x8x8xf32>
    tpu.vector_store %arg13[%c0_55, %c3, %c0_56, %c0_57], %130 {strides = array<i32>} : memref<1x4x8x8xf32, #tpu.memory_space<vmem>>, vector<1x1x8x8xf32>,
    "tpu.trace_start"() <{level = 10 : i32, message = "bqk,bkd->bqd"}> : () -> ()
    %cst_58 = arith.constant dense<0.000000e+00> : vector<1x8x8xf32>
    %131 = tpu.matmul %127, %110, %cst_58 {dimension_numbers = #tpu.dot_dimension_numbers<[2], [1], [1], [2], [0, 0, 0, 1, 1, 2], [0], [0]>} : vector<1x8x8xf32>, vector<1x8x8xf32>, vector<1x8x8xf32> -> vector<1x8x8xf32>
    "tpu.trace_stop"() : () -> ()
    %132 = vector.shape_cast %131 : vector<1x8x8xf32> to vector<8x8xf32>
    %133 = tpu.concatenate %48, %76, %104, %132 in 1 : vector<8x8xf32>, vector<8x8xf32>, vector<8x8xf32>, vector<8x8xf32> -> vector<8x32xf32>
    %c0_59 = arith.constant 0 : index
    %c0_60 = arith.constant 0 : index
    %134 = vector.load %arg10[%c0_59, %c0_60] : memref<32x32xf32, #tpu.memory_space<vmem>>, vector<32x32xf32>
    %cst_61 = arith.constant dense<0.000000e+00> : vector<8x32xf32>
    %135 = tpu.matmul %133, %134, %cst_61 {dimension_numbers = #tpu.dot_dimension_numbers<[1], [0], [0], [1], [0, 0, 1, 1], [], []>} : vector<8x32xf32>, vector<32x32xf32>, vector<8x32xf32> -> vector<8x32xf32>
    %c0_62 = arith.constant 0 : index
    %c0_63 = arith.constant 0 : index
    %136 = vector.load %arg11[%c0_62, %c0_63] : memref<1x32xf32, #tpu.memory_space<vmem>>, vector<1x32xf32>
    %137 = vector.broadcast %136 : vector<1x32xf32> to vector<8x32xf32>
    %138 = arith.addf %135, %137 : vector<8x32xf32>
    %139 = vector.shape_cast %138 : vector<8x32xf32> to vector<1x8x32xf32>
    %c0_64 = arith.constant 0 : index
    %c0_65 = arith.constant 0 : index
    %c0_66 = arith.constant 0 : index
    %140 = vector.load %arg12[%c0_64, %c0_65, %c0_66] : memref<1x8x32xf32, #tpu.memory_space<vmem>>, vector<1x8x32xf32>
    tpu.vector_store %arg12[%c0_64, %c0_65, %c0_66], %139 {strides = array<i32>} : memref<1x8x32xf32, #tpu.memory_space<vmem>>, vector<1x8x32xf32>,
    return
  }
  func.func @transform_0(%arg0: i32) -> (i32, i32, i32) {
    %c0_i32 = arith.constant 0 : i32
    %c0_i32_0 = arith.constant 0 : i32
    %c0_i32_1 = arith.constant 0 : i32
    return %arg0, %c0_i32, %c0_i32_0 : i32, i32, i32
  }
  func.func @transform_1(%arg0: i32) -> (i32, i32, i32) {
    %c0_i32 = arith.constant 0 : i32
    %c0_i32_0 = arith.constant 0 : i32
    %c0_i32_1 = arith.constant 0 : i32
    return %arg0, %c0_i32, %c0_i32_0 : i32, i32, i32
  }
  func.func @transform_2(%arg0: i32) -> (i32, i32, i32) {
    %c0_i32 = arith.constant 0 : i32
    %c0_i32_0 = arith.constant 0 : i32
    %c0_i32_1 = arith.constant 0 : i32
    return %arg0, %c0_i32, %c0_i32_0 : i32, i32, i32
  }
  func.func @transform_3(%arg0: i32) -> (i32, i32) {
    %c0_i32 = arith.constant 0 : i32
    %c0_i32_0 = arith.constant 0 : i32
    %c0_i32_1 = arith.constant 0 : i32
    return %c0_i32, %c0_i32_0 : i32, i32
  }
  func.func @transform_4(%arg0: i32) -> (i32, i32) {
    %c0_i32 = arith.constant 0 : i32
    %c0_i32_0 = arith.constant 0 : i32
    %c0_i32_1 = arith.constant 0 : i32
    return %c0_i32, %c0_i32_0 : i32, i32
  }
  func.func @transform_5(%arg0: i32) -> (i32, i32) {
    %c0_i32 = arith.constant 0 : i32
    %c0_i32_0 = arith.constant 0 : i32
    %c0_i32_1 = arith.constant 0 : i32
    return %c0_i32, %c0_i32_0 : i32, i32
  }
  func.func @transform_6(%arg0: i32) -> (i32, i32) {
    %c0_i32 = arith.constant 0 : i32
    %c0_i32_0 = arith.constant 0 : i32
    %c0_i32_1 = arith.constant 0 : i32
    return %c0_i32, %c0_i32_0 : i32, i32
  }
  func.func @transform_7(%arg0: i32) -> (i32, i32) {
    %c0_i32 = arith.constant 0 : i32
    %c0_i32_0 = arith.constant 0 : i32
    %c0_i32_1 = arith.constant 0 : i32
    return %c0_i32, %c0_i32_0 : i32, i32
  }
  func.func @transform_8(%arg0: i32) -> (i32, i32) {
    %c0_i32 = arith.constant 0 : i32
    %c0_i32_0 = arith.constant 0 : i32
    %c0_i32_1 = arith.constant 0 : i32
    return %c0_i32, %c0_i32_0 : i32, i32
  }
  func.func @transform_9(%arg0: i32) -> (i32, i32) {
    %c0_i32 = arith.constant 0 : i32
    %c0_i32_0 = arith.constant 0 : i32
    %c0_i32_1 = arith.constant 0 : i32
    return %c0_i32, %c0_i32_0 : i32, i32
  }
  func.func @transform_10(%arg0: i32) -> (i32, i32) {
    %c0_i32 = arith.constant 0 : i32
    %c0_i32_0 = arith.constant 0 : i32
    %c0_i32_1 = arith.constant 0 : i32
    return %c0_i32, %c0_i32_0 : i32, i32
  }
  func.func @transform_11(%arg0: i32) -> (i32, i32, i32) {
    %c0_i32 = arith.constant 0 : i32
    %c0_i32_0 = arith.constant 0 : i32
    %c0_i32_1 = arith.constant 0 : i32
    return %arg0, %c0_i32, %c0_i32_0 : i32, i32, i32
  }
  func.func @transform_12(%arg0: i32) -> (i32, i32, i32, i32) {
    %c0_i32 = arith.constant 0 : i32
    %c0_i32_0 = arith.constant 0 : i32
    %c0_i32_1 = arith.constant 0 : i32
    %c0_i32_2 = arith.constant 0 : i32
    return %arg0, %c0_i32, %c0_i32_0, %c0_i32_1 : i32, i32, i32, i32
  }
}

</mosaic_0001>

<bundles_post_ra>
// kernel: tpu_custom_call.1
= control target key start
LH: loop header
LB: loop body
LE: loop exit
PB: predicated region body
PF: predicated region fallthrough
CT: control target
= control target key end

     0   :  { %s2945_s0 = inlined_call_operand.hbm [shape: f32[2,8,32], index: 0, kind: input, shape index: {}]   ;;  %s2946_s1 = inlined_call_operand.hbm [shape: f32[2,8,32], index: 1, kind: input, shape index: {}]   ;;  %s2947_s2 = inlined_call_operand.hbm [shape: f32[2,8,32], index: 2, kind: input, shape index: {}]   ;;  %s2948_s3 = inlined_call_operand.hbm [shape: f32[32,32], index: 3, kind: input, shape index: {}]   ;;  %s2949_s4 = inlined_call_operand.vmem [shape: f32[1,32], index: 4, kind: input, shape index: {}]   ;;  %s2950_s5 = inlined_call_operand.hbm [shape: f32[32,32], index: 5, kind: input, shape index: {}]   ;;  %s2951_s6 = inlined_call_operand.vmem [shape: f32[1,32], index: 6, kind: input, shape index: {}]   ;;  %s2952_s7 = inlined_call_operand.hbm [shape: f32[32,32], index: 7, kind: input, shape index: {}]   ;;  %s2953_s8 = inlined_call_operand.vmem [shape: f32[1,32], index: 8, kind: input, shape index: {}]   ;;  %s2954_s9 = inlined_call_operand.hbm [shape: f32[32,32], index: 9, kind: input, shape index: {}]   ;;  %s2955_s10 = inlined_call_operand.vmem [shape: f32[1,32], index: 10, kind: input, shape index: {}]   ;;  %s2956_s11 = inlined_call_operand.hbm [shape: f32[2,8,32], index: 11, kind: output, shape index: {0}]   ;;  %s2957_s12 = inlined_call_operand.hbm [shape: f32[2,4,8,8], index: 12, kind: output, shape index: {1}]  }
   0x1   :  { %2979 = sst [smem:[#allocation28_spill]] %s2945_s0 }
   0x2   :  { %2980 = sst [smem:[#allocation29_spill]] %s2946_s1 }
   0x3   :  { %2981 = sst [smem:[#allocation30_spill]] %s2948_s3 }
   0x4   :  { %2982 = sst [smem:[#allocation31_spill]] %s2952_s7 }
   0x5   :  { %2983 = sst [smem:[#allocation32_spill]] %s2955_s10 }
   0x6   :  { %2984 = sst [smem:[#allocation33_spill]] %s2956_s11 }
   0x7   :  { %2985 = sst [smem:[#allocation34_spill]] %s2957_s12 }
   0x8   :  { %18 = vsyncpa [#allocation3], 0 }
   0x9   :  { %20 = vsyncpa [#allocation3 + $0x1], 0 }
   0xa   :  { %21 = vsyncpa [#allocation6], 0 }
   0xb   :  { %23 = vsyncpa [#allocation6 + $0x1], 0 }
   0xc   :  { %24 = vsyncpa [#allocation9], 0 }
   0xd   :  { %25 = vsyncpa [#allocation12], 0 }
   0xe   :  { %26 = vsyncpa [#allocation4], 0 }
   0xf   :  { %28 = vsyncpa [#allocation4 + $0x1], 0 }
  0x10   :  { %29 = vsyncpa [#allocation16], 0 }
  0x11   :  { %31 = vsyncpa [#allocation16 + $0x1], 0  ;;  %s2509_s21 = smov 0   ;;  %s2511_s22 = smov 0  }
  0x12   :  { %s2513_s23 = smov 0   ;;  %s2515_s24 = smov 0  }
  0x13 LB: > { %2986 = sst [smem:[#allocation23_spill]] %s2410_s21  ;;  %s2424_s25 = smov [#allocation8]   ;;  %s2422_s24 = sphi %s2515_s24, %s3024_s24   ;;  %s2418_s23 = sphi %s2513_s23, %s3028_s23   ;;  %s2414_s22 = sphi %s2511_s22, %s3027_s22   ;;  %s2410_s21 = sphi %s2509_s21, %s3026_s21  }
  0x14   : > { %2987 = sst [smem:[#allocation24_spill]] %s2422_s24  ;;  %s352_s26 = sshll.u32 %s2424_s25, 4  ;;  %s353_s26 = int_to_ptr.vmem [resolvable:$true] %s352_s26 }
  0x15   : > { %s2530_s27 = sadd.s32 4294967295, %s2422_s24   ;;  %p1826_p0 = scmp.ge.s32.totalorder %s2422_s24, 1 }
  0x16   : > { %p2971_p1 = scmp.eq.s32.totalorder %s2530_s27, 0  ;;  %p340_p2 = scmp.lt.s32.totalorder %s2422_s24, 3 }
  0x17   : > { %s2425_s29 = smov [#allocation11]   ;;  %s2139_s14 = scalar_lea.vmem %s353_s26, 512 }
  0x18   : > { %p2535_p3 = pnand %p1826_p0, %p340_p2  ;;  %s384_s30 = sshll.u32 %s2425_s29, 4  ;;  %s385_s30 = int_to_ptr.vmem [resolvable:$true] %s384_s30 }
  0x19   : > { %p2140_p8 = scmp.ne.s32.totalorder %s353_s26, %s2139_s14  ;;  %p2147_p11 = scmp.lt.s32.totalorder %s353_s26, %s353_s26 }
  0x1a   : > { %s2988_s28 = scalar_select %p2535_p3, 1, 0 }
  0x1b   : > { %p2025_p5 = pneg %p2535_p3  ;;  %p2148_p12 = scmp.lt.s32.totalorder %s2139_s14, %s2139_s14 }
  0x1d   : > { %p2544_p6 = pnand %p2025_p5, %p2971_p1  ;;  %p2149_p13 = por %p2148_p12, %p2147_p11 }
  0x1f   : > { %s2989_s13 = scalar_select %p2544_p6, 1, 0 }
  0x20   : > { %p2958_p7 = pneg %p2544_p6 }
  0x22   : > { %p2142_p9 = pnand %p2140_p8, %p2958_p7 }
  0x24   : > { %p2143_p10 = pneg %p2142_p9 }
  0x26   : > { %p2150_p0 = pnand %p2149_p13, %p2143_p10 }
  0x28   : > { %2153 = shalt.err (!%p2150_p0)
}
  0x29   : > { %s2959_s15 = smov 128   ;;  %s2961_s16 = smov 8  }
  0x2a   : > { %s2990_s3 = sld [smem:[#allocation30_spill]]  ;;  %s2165_s19 = scalar_lea.vmem %s385_s30, 512 }
  0x2b   : > { %p2166_p2 = scmp.ne.s32.totalorder %s385_s30, %s2165_s19  ;;  %p2173_p9 = scmp.lt.s32.totalorder %s385_s30, %s385_s30 }
  0x2c   : > { %p2174_p10 = scmp.lt.s32.totalorder %s2165_s19, %s2165_s19 }
  0x2d   : > { %p2168_p5 = pnand %p2166_p2, %p2958_p7 }
  0x2e   : > { %p2175_p11 = por %p2174_p10, %p2173_p9 }
  0x2f   : > { %p2169_p8 = pneg %p2168_p5 }
  0x30   : > { %2028 = dma.hbm_to_vmem [thread:$0]  (!%p2544_p6), %s2990_s3, 512, %s353_s26, [#allocation9], %s2959_s15, %s2959_s15, %s2961_s16  }
  0x31   : > { %p2176_p12 = pnand %p2175_p11, %p2169_p8 }
  0x33   : > { %2179 = shalt.err (!%p2176_p12)
}
  0x34   : > { %s2991_s7 = sld [smem:[#allocation31_spill]]  ;;  %s1825_s26 = sadd.s32 4294967294, %s2422_s24  }
  0x35   : > { %s2574_s29 = sadd.s32 1, %s2422_s24   ;;  %s44_s17 = sadd.s32 1, %s2418_s23 }
  0x36   : > { %2992 = sst [smem:[#allocation25_spill]] %s2574_s29  ;;  %s41_s14 = ssub.s32 %s2422_s24, %s2574_s29 }
  0x37   : > { %p42_p13 = scmp.eq.s32.totalorder %s41_s14, 0  ;;  %p51_p0 = scmp.ne.s32.totalorder %s2418_s23, %s2414_s22 }
  0x38   : > { %p52_p2 = scmp.eq.s32.totalorder %s2422_s24, 0  ;;  %p57_p5 = scmp.ne.s32.totalorder %s2414_s22, %s2410_s21 }
  0x39   : > { %s2585_s18 = scalar_select %p42_p13, %s2418_s23, %s44_s17  }
  0x3a   : > { %2034 = dma.hbm_to_vmem [thread:$0]  (!%p2544_p6), %s2991_s7, 512, %s385_s30, [#allocation12], %s2959_s15, %s2959_s15, %s2961_s16  }
  0x3b   : > { %2993 = sst [smem:[#allocation26_spill]] %s2585_s18  ;;  %p53_p8 = por %p52_p2, %p51_p0 }
  0x3c   : > { %p2589_p9 = por %p2971_p1, %p57_p5  ;;  %p301_p10 = scmp.eq.s32.totalorder %s2530_s27, 1 }
  0x3d   : > { %p307_p11 = scmp.eq.s32.totalorder %s1825_s26, 1  ;;  %p2059_p12 = scmp.lt.s32.totalorder %s2422_s24, 2 }
  0x3e   : > { %s2994_s19 = scalar_select %p2589_p9, 1, 0 }
  0x3f   : > { %s2963_s30 = sand.u32 1, %s2418_s23   ;;  %p2596_p4 = por %p301_p10, %p51_p0 }
  0x40   : > { %p2600_p7 = por %p307_p11, %p57_p5  ;;  %s2606_s14 = sshll.u32 %s2963_s30, 3 }
  0x41   : > { %s2995_s20 = scalar_select %p2596_p4, 1, 0 }
  0x42   : > { %s2996_s25 = scalar_select %p2600_p7, 1, 0 }
  0x43   : > { %s2609_s17 = sshll.u32 %s2422_s24, 7  ;;  %p2611_p13 = pnand %p2059_p12, %p53_p8 }
  0x44   : > { %2997 = sst [smem:[#allocation27_spill]] %s2996_s25  ;;  %s435_s26 = sand.u32 1, %s2422_s24  }
  0x45   : > { %s2999_s1 = sld [smem:[#allocation29_spill]]  ;;  %s439_s30 = scalar_lea.vmem [#allocation5], %s2606_s14 }
  0x46   : > { %s446_s18 = sshll.u32 %s439_s30, 4  ;;  %s2428_s29 = smov [#allocation10]   ;;  %s2623_s18 = int_to_ptr.vmem [resolvable:$true] %s446_s18 }
  0x47   : > { %s368_s25 = sshll.u32 %s2428_s29, 4  ;;  %s2625_s21 = scalar_lea.sflag [#allocation6], %s435_s26  ;;  %s369_s25 = int_to_ptr.vmem [resolvable:$true] %s368_s25 }
  0x48   : > { %p2631_p2 = pneg %p2611_p13 }
  0x4a   : > { %s3000_s24 = scalar_select %p2631_p2, 1, 0 }
  0x4b   : > { %s2620_s7 = scalar_lea.hbm %s2999_s1, %s2609_s17  ;;  %s2185_s30 = scalar_lea.hbm %s2999_s1, 256 }
  0x4c   : > { %s2180_s11 = scalar_lea.hbm %s2620_s7, 128  ;;  %p2186_p10 = scmp.lt.s32.totalorder %s2620_s7, %s2999_s1 }
  0x4d   : > { %p2181_p0 = scmp.ne.s32.totalorder %s2620_s7, %s2180_s11  ;;  %p2187_p11 = scmp.lt.s32.totalorder %s2185_s30, %s2180_s11 }
  0x4f   : > { %p2183_p5 = pnand %p2631_p2, %p2181_p0  ;;  %p2188_p12 = por %p2187_p11, %p2186_p10 }
  0x51   : > { %p2184_p8 = pneg %p2183_p5 }
  0x53   : > { %p2189_p1 = pnand %p2188_p12, %p2184_p8 }
  0x55   : > { %2192 = shalt.err (!%p2189_p1)
}
  0x56   : > { %s2193_s29 = scalar_lea.vmem %s2623_s18, 128  ;;  %s2429_s26 = smov [#allocation5]  }
  0x57   : > { %p2194_p7 = scmp.ne.s32.totalorder %s2623_s18, %s2193_s29  ;;  %s2198_s3 = sshll.u32 %s2429_s26, 4  ;;  %s2199_s3 = int_to_ptr.vmem [resolvable:$false] %s2198_s3 }
  0x58   : > { %s2200_s16 = scalar_lea.vmem %s2199_s3, 256  ;;  %p2201_p4 = scmp.lt.s32.totalorder %s2623_s18, %s2199_s3 }
  0x59   : > { %p2196_p0 = pnand %p2194_p7, %p2631_p2  ;;  %p2202_p9 = scmp.lt.s32.totalorder %s2200_s16, %s2193_s29 }
  0x5b   : > { %p2197_p5 = pneg %p2196_p0  ;;  %p2203_p3 = por %p2202_p9, %p2201_p4 }
  0x5d   : > { %p2204_p6 = pnand %p2203_p3, %p2197_p5 }
  0x5f   : > { %2207 = shalt.err (!%p2204_p6)
}
  0x60   : > { %2044 = dma.hbm_to_vmem [thread:$0]  (!%p2611_p13), %s2620_s7, 128, %s2623_s18, %s2625_s21  }
  0x61   : > { %s2219_s10 = scalar_lea.vmem %s369_s25, 512  ;;  %p3001_p7 = scmp.ne.s32.totalorder %s2989_s13, 0 }
  0x62   : > { %p2220_p1 = scmp.ne.s32.totalorder %s369_s25, %s2219_s10  ;;  %p2227_p12 = scmp.lt.s32.totalorder %s369_s25, %s369_s25 }
  0x63   : > { %p3002_p8 = pneg %p3001_p7  ;;  %p2228_p0 = scmp.lt.s32.totalorder %s2219_s10, %s2219_s10 }
  0x65   : > { %p2222_p10 = pnand %p2220_p1, %p3002_p8  ;;  %p2229_p2 = por %p2228_p0, %p2227_p12 }
  0x67   : > { %p2223_p11 = pneg %p2222_p10 }
  0x69   : > { %p2230_p4 = pnand %p2229_p2, %p2223_p11 }
  0x6b   : > { %2233 = shalt.err (!%p2230_p4)
}
  0x6c   : > { %s3003_s11 = smov 8   ;;  %s3004_s12 = smov 128  }
  0x6d   : > { %2031 = dma.hbm_to_vmem [thread:$0]  (!%p3001_p7), %s2950_s5, 512, %s369_s25, [#allocation9], %s3004_s12, %s3004_s12, %s3003_s11  }
  0x6e   : > { %s2430_s7 = smov [#allocation13]   ;;  %p3005_p6 = pmov %p3002_p8 }
  0x6f   : > { %s400_s18 = sshll.u32 %s2430_s7, 4  ;;  %s401_s18 = int_to_ptr.vmem [resolvable:$true] %s400_s18 }
  0x70   : > { %s2245_s26 = scalar_lea.vmem %s401_s18, 512  ;;  %p2253_p5 = scmp.lt.s32.totalorder %s401_s18, %s401_s18 }
  0x71   : > { %p2246_p3 = scmp.ne.s32.totalorder %s401_s18, %s2245_s26  ;;  %p2254_p1 = scmp.lt.s32.totalorder %s2245_s26, %s2245_s26 }
  0x73   : > { %p2248_p9 = pnand %p2246_p3, %p3005_p6  ;;  %p2255_p8 = por %p2254_p1, %p2253_p5 }
  0x75   : > { %p2249_p2 = pneg %p2248_p9 }
  0x77   : > { %p2256_p10 = pnand %p2255_p8, %p2249_p2 }
  0x79   : > { %2259 = shalt.err (!%p2256_p10)
}
  0x7a   : > { %2037 = dma.hbm_to_vmem [thread:$0]  (!%p3001_p7), %s2954_s9, 512, %s401_s18, [#allocation12], %s3004_s12, %s3004_s12, %s3003_s11  }
  0x7b   : > { %s3006_s0 = sld [smem:[#allocation28_spill]]  ;;  %s421_s13 = scalar_lea.vmem [#allocation2], %s2606_s14 }
  0x7c   : > { %s428_s29 = sshll.u32 %s421_s13, 4  ;;  %s3007_s7 = sand.u32 1, %s2418_s23   ;;  %s429_s29 = int_to_ptr.vmem [resolvable:$true] %s428_s29 }
  0x7d   : > { %s418_s26 = scalar_lea.sflag [#allocation3], %s3007_s7  ;;  %p3008_p12 = scmp.ne.s32.totalorder %s3000_s24, 0 }
  0x81   : > { %s2680_s30 = scalar_lea.hbm %s3006_s0, %s2609_s17  ;;  %s2265_s12 = scalar_lea.hbm %s3006_s0, 256 }
  0x82   : > { %s2260_s1 = scalar_lea.hbm %s2680_s30, 128  ;;  %p2266_p7 = scmp.lt.s32.totalorder %s2680_s30, %s3006_s0 }
  0x83   : > { %p2261_p11 = scmp.ne.s32.totalorder %s2680_s30, %s2260_s1  ;;  %p2267_p3 = scmp.lt.s32.totalorder %s2265_s12, %s2260_s1 }
  0x85   : > { %p2263_p0 = pnand %p2261_p11, %p3008_p12  ;;  %p2268_p6 = por %p2267_p3, %p2266_p7 }
  0x87   : > { %p2264_p4 = pneg %p2263_p0 }
  0x89   : > { %p2269_p9 = pnand %p2268_p6, %p2264_p4 }
  0x8b   : > { %2272 = shalt.err (!%p2269_p9)
}
  0x8c   : > { %s2273_s16 = scalar_lea.vmem %s429_s29, 128  ;;  %s2431_s10 = smov [#allocation2]  }
  0x8d   : > { %p2274_p2 = scmp.ne.s32.totalorder %s429_s29, %s2273_s16  ;;  %s2278_s13 = sshll.u32 %s2431_s10, 4  ;;  %s2279_s13 = int_to_ptr.vmem [resolvable:$false] %s2278_s13 }
  0x8e   : > { %s2280_s7 = scalar_lea.vmem %s2279_s13, 256  ;;  %p2281_p8 = scmp.lt.s32.totalorder %s429_s29, %s2279_s13 }
  0x8f   : > { %p2276_p5 = pnand %p2274_p2, %p3008_p12  ;;  %p2282_p10 = scmp.lt.s32.totalorder %s2280_s7, %s2273_s16 }
  0x91   : > { %p2277_p1 = pneg %p2276_p5  ;;  %p2283_p11 = por %p2282_p10, %p2281_p8 }
  0x93   : > { %p2284_p0 = pnand %p2283_p11, %p2277_p1 }
  0x95   : > { %2287 = shalt.err (!%p2284_p0)
}
  0x96   : > { %2041 = dma.hbm_to_vmem [thread:$0]  (!%p2611_p13), %s2680_s30, 128, %s429_s29, %s418_s26  }
  0x97   : > { %s462_s11 = scalar_lea.hbm %s2947_s2, %s2609_s17  ;;  %s457_s12 = scalar_lea.vmem [#allocation7], %s2606_s14 }
  0x98   : > { %s464_s18 = sshll.u32 %s457_s12, 4  ;;  %s2288_s3 = scalar_lea.hbm %s462_s11, 128  ;;  %s465_s18 = int_to_ptr.vmem [resolvable:$true] %s464_s18 }
  0x99   : > { %p2289_p4 = scmp.ne.s32.totalorder %s462_s11, %s2288_s3  ;;  %s2293_s13 = scalar_lea.hbm %s2947_s2, 256 }
  0x9a   : > { %p2294_p6 = scmp.lt.s32.totalorder %s462_s11, %s2947_s2  ;;  %p2295_p9 = scmp.lt.s32.totalorder %s2293_s13, %s2288_s3 }
  0x9b   : > { %p2291_p7 = pnand %p2289_p4, %p3008_p12 }
  0x9c   : > { %p2296_p2 = por %p2295_p9, %p2294_p6 }
  0x9d   : > { %p2292_p3 = pneg %p2291_p7 }
  0x9f   : > { %p2297_p5 = pnand %p2296_p2, %p2292_p3 }
  0xa1   : > { %2300 = shalt.err (!%p2297_p5)
}
  0xa2   : > { %s2301_s14 = scalar_lea.vmem %s465_s18, 128  ;;  %s2432_s17 = smov [#allocation7]  }
  0xa3   : > { %p2302_p1 = scmp.ne.s32.totalorder %s465_s18, %s2301_s14  ;;  %s2306_s30 = sshll.u32 %s2432_s17, 4  ;;  %s2307_s30 = int_to_ptr.vmem [resolvable:$false] %s2306_s30 }
  0xa4   : > { %s2308_s29 = scalar_lea.vmem %s2307_s30, 256  ;;  %p2309_p11 = scmp.lt.s32.totalorder %s465_s18, %s2307_s30 }
  0xa5   : > { %p2304_p8 = pnand %p2302_p1, %p3008_p12  ;;  %p2310_p0 = scmp.lt.s32.totalorder %s2308_s29, %s2301_s14 }
  0xa7   : > { %p2305_p10 = pneg %p2304_p8  ;;  %p2311_p4 = por %p2310_p0, %p2309_p11 }
  0xa9   : > { %p2312_p7 = pnand %p2311_p4, %p2305_p10 }
  0xab   : > { %2315 = shalt.err (!%p2312_p7)
}
  0xac   : > { %2047 = dma.hbm_to_vmem [thread:$0]  (!%p2611_p13), %s462_s11, 128, %s465_s18, %s2625_s21  }
  0xad   : > { %p3009_p3 = scmp.ne.s32.totalorder %s2988_s28, 0 }
  0xae   : > { %s2722_s0 = sand.u32 (!%p3009_p3), 1, %s2414_s22   ;;  %p3010_p12 = scmp.ne.s32.totalorder (!%p3009_p3), %s2994_s19, 0 }
  0xaf   : > { %473 = sbr.rel (%p3009_p3) target bundleno = 1954 (0x7a2), region = 64  ;;  %s2725_s24 = sshll.u32 (!%p3009_p3), %s2722_s0, 3 }
  0xb0   : > { %s476_s26 = scalar_lea.sflag (!%p3009_p3), [#allocation3], %s2722_s0  ;;  %s479_s1 = scalar_lea.vmem (!%p3009_p3), [#allocation2], %s2725_s24 }
  0xb4   : > { %2385 = dma.done.wait (%p3010_p12), %s476_s26, 128  }
  0xb5   : > { %2387 = vsyncadd (%p3010_p12), %s476_s26, 4294967168  ;;  %s484_s21 = sand.u32 1, %s2530_s27   ;;  %s488_s15 = scalar_lea.vmem [#allocation5], %s2725_s24 }
  0xb6   : > { %s485_s28 = scalar_lea.sflag [#allocation6], %s484_s21 }
  0xb7   : > { %2389 = dma.done.wait (%p3010_p12), %s485_s28, 256  }
  0xb8   : > { %2391 = vsyncadd (%p3010_p12), %s485_s28, 4294967040  ;;  %s497_s25 = scalar_lea.vmem [#allocation7], %s2725_s24  ;;  %p3011_p13 = scmp.eq.s32.totalorder %s2530_s27, 0 }
  0xba   : > { %2393 = dma.done.wait (%p3011_p13), [#allocation9], 1024   ;;  %p3012_p6 = pmov %p3011_p13 }
  0xbc   : > { %2395 = vsyncadd (%p3012_p6), [#allocation9], 4294966272  ;;  %p3013_p9 = pmov %p3012_p6 }
  0xbd   : > { %p3014_p2 = pmov %p3012_p6 }
  0xbe   : > { %2397 = dma.done.wait (%p3013_p9), [#allocation12], 1024  }
  0xbf   : > { %2399 = vsyncadd (%p3014_p2), [#allocation12], 4294966272  ;;  %v2433_v0 = vmov 0.0   ;;  %vm2434_vm0 = vmmov 0   ;;  %v660_v1 = vld [vmem:[#allocation10 + $0x18] sm:$0xff]  ;;  %v659_v3 = vld [vmem:[#allocation10 + $0x10] sm:$0xff] }
  0xc0   : > { %1926 = vmatprep.subr.mxu1 %v2433_v0  ;;  %1915 = vmatprep.subr.mxu0 %v2433_v0  ;;  %v575_v2 = vld [vmem:[#allocation8 + $0x18] sm:$0xff]  ;;  %v574_v4 = vld [vmem:[#allocation8 + $0x10] sm:$0xff]  ;;  %v658_v5 = vld [vmem:[#allocation10 + $0x8] sm:$0xff]  ;;  %vm583_vm1 = vcmask 261120   ;;  %vm825_vm2 = vcmask 64512   ;;  %s2435_s3 = smov 120  }
  0xc1   : > { %1934 = vmatprep.mubr.msk.f32.mxu1 %vm2434_vm0, %v2433_v0  ;;  %1923 = vmatprep.mubr.msk.f32.mxu0 %vm2434_vm0, %v2433_v0  ;;  %v573_v6 = vld [vmem:[#allocation8 + $0x8] sm:$0xff]  ;;  %v657_v7 = vld [vmem:[#allocation10] sm:$0xff]  ;;  %v569_v10 = vld [vmem:[%s479_s1] sm:$0xff]  ;;  %s2436_s16 = smov 112   ;;  %s2437_s10 = smov 104   ;;  %vm1518_vm3 = vcmask 130048  }
  0xc2   : > { %1927 = vmatpush3.msra.mxu1 %v660_v1  ;;  %1916 = vmatpush3.msra.mxu0 %v575_v2  ;;  %v572_v8 = vld [vmem:[#allocation8] sm:$0xff]  ;;  %v1850_v11 = vld [vmem:[%s2951_s6] ss:$0 sm:$0xff]  ;;  %v744_v19 = vld [vmem:[#allocation11 + $0x18] sm:$0xff]  ;;  %s1847_s14 = sshll.u32 %s2722_s0, 5  ;;  %s2438_s30 = smov 8  }
  0xc3   : > { %1928 = vmatprep.subr.mxu1 %v2433_v0  ;;  %1917 = vmatprep.subr.mxu0 %v2433_v0  ;;  %v570_v9 = vld [vmem:[%s488_s15] sm:$0xff]  ;;  %v1848_v12 = vld [vmem:[%s2949_s4] ss:$0 sm:$0xff]  ;;  %s2818_s17 = scalar_lea.vmem [#allocation15], %s1847_s14  ;;  %s2439_s29 = smov 16   ;;  %vm1520_vm4 = vcmask 195584  }
  0xc4   : > { %1929 = vmatpush3.msra.mxu1 %v659_v3  ;;  %1918 = vmatpush3.msra.mxu0 %v574_v4  ;;  %v743_v20 = vld [vmem:[#allocation11 + $0x10] sm:$0xff]  ;;  %v742_v21 = vld [vmem:[#allocation11 + $0x8] sm:$0xff]  ;;  %v741_v22 = vld [vmem:[#allocation11] sm:$0xff]  ;;  %s2440_s26 = smov 24   ;;  %s1878_s1 = sshll.u32 %s2530_s27, 9 }
  0xc5   : > { %1930 = vmatprep.subr.mxu1 %v2433_v0  ;;  %1919 = vmatprep.subr.mxu0 %v2433_v0  ;;  %v571_v23 = vld [vmem:[%s497_s25] sm:$0xff]  ;;  %s1639_s21 = sshll.u32 %s2818_s17, 4  ;;  %s3015_s25 = sld [smem:[#allocation34_spill]]  ;;  %s2873_s21 = int_to_ptr.vmem [resolvable:$true] %s1639_s21 }
  0xc6   : > { %1931 = vmatpush3.msra.mxu1 %v658_v5  ;;  %1920 = vmatpush3.msra.mxu0 %v573_v6  ;;  %v1852_v34 = vld [vmem:[%s2953_s8] ss:$0 sm:$0xff]  ;;  %s1613_s11 = scalar_lea.sflag [#allocation16], %s2722_s0  ;;  %s2316_s12 = scalar_lea.vmem %s2873_s21, 512 }
  0xc7   : > { %1932 = vmatprep.subr.mxu1 %v2433_v0  ;;  %1921 = vmatprep.subr.mxu0 %v2433_v0  ;;  %p2317_p5 = scmp.ne.s32.totalorder %s2873_s21, %s2316_s12  ;;  %p3016_p1 = scmp.ne.s32.totalorder %s2995_s20, 0 }
  0xc8   : > { %1933 = vmatpush3.msra.mxu1 %v657_v7  ;;  %1922 = vmatpush3.msra.mxu0 %v572_v8  ;;  %s2441_s18 = smov [#allocation15]  }
  0xc9   : > { %1935 = vmatmul.mubr.msk.f32.vlgmr.msra.gmra.mxu1 %vm583_vm1, %v570_v9  ;;  %1924 = vmatmul.mubr.msk.f32.vlgmr.msra.gmra.mxu0 %vm583_vm1, %v569_v10  ;;  %p2318_p8 = pnand %p2317_p5, %p3016_p1 }
  0xca   : > { %1948 = vmatprep.subr.mxu1 %v2433_v0  ;;  %1950 = vmatprep.mubr.msk.f32.mxu1 %vm2434_vm0, %v2433_v0 }
  0xcb   : > { %1937 = vmatprep.subr.mxu0 %v2433_v0  ;;  %1945 = vmatprep.mubr.msk.f32.mxu0 %vm2434_vm0, %v2433_v0  ;;  %s2871_s19 = scalar_lea.hbm %s3015_s25, %s1878_s1  ;;  %p2319_p10 = pneg %p2318_p8 }
  0xcc   : > { %1938 = vmatpush3.msra.mxu0 %v744_v19 }
  0xcd   : > { %1939 = vmatprep.subr.mxu0 %v2433_v0 }
  0xce   : > { %1940 = vmatpush3.msra.mxu0 %v743_v20 }
  0xcf   : > { %1941 = vmatprep.subr.mxu0 %v2433_v0 }
  0xd0   : > { %1942 = vmatpush3.msra.mxu0 %v742_v21 }
  0xd1   : > { %1943 = vmatprep.subr.mxu0 %v2433_v0 }
  0xd2   : > { %1944 = vmatpush3.msra.mxu0 %v741_v22 }
  0xd3   : > { %1946 = vmatmul.mubr.msk.f32.vlgmr.msra.gmra.mxu0 %vm583_vm1, %v571_v23  ;;  %1968 = vmatprep.subr.mxu0 %v2433_v0 }
  0xd4   : > { %1970 = vmatprep.mubr.msk.f32.mxu0 %vm2434_vm0, %v2433_v0 }
 0x189   : > { %v737_v13 = vpop.f32.mrf.mxu1  ;;  %v653_v14 = vpop.f32.mrf.mxu0 }
 0x18a   : > { %v738_v15 = vadd.f32 %v1850_v11, %v737_v13  ;;  %v654_v16 = vadd.f32 %v1848_v12, %v653_v14 }
 0x18b   : > { %v1936_v17 = vpop.f32.mrf.mxu1  ;;  %v1925_v18 = vpop.f32.mrf.mxu0 }
 0x18c   : > { %993 = vrot.lane.b32.xlu1 %v738_v15, %s2435_s3  ;;  %1949 = vmatpush3.xpose.msk.msra.mxu1 %vm825_vm2, %v738_v15 }
 0x18d   : > { %1953 = vmatprep.subr.mxu1 %v2433_v0 }
 0x18f   : > { %1951 = vmatmul.mubr.msk.f32.vlgmr.msra.gmra.mxu1 %vm825_vm2, %v654_v16 }
 0x190   : > { %991 = vrot.lane.b32.xlu1 %v654_v16, %s2435_s3  ;;  %1955 = vmatprep.mubr.msk.f32.mxu1 %vm2434_vm0, %v2433_v0 }
 0x193   : > { %v821_v33 = vpop.f32.mrf.mxu0 }
 0x194   : > { %1163 = vrot.lane.b32.xlu1 %v654_v16, %s2436_s16  ;;  %v2803_v35 = vadd.f32 %v1852_v34, %v821_v33 }
 0x195   : > { %v1947_v36 = vpop.f32.mrf.mxu0 }
 0x196   : > { %1954 = vmatpush3.msra.mxu1 %v2803_v35  ;;  %v1525_v36 = vld [vmem:[#allocation13 + $0x18] sm:$0xff] }
 0x197   : > { %1958 = vmatprep.subr.mxu1 %v2433_v0 }
 0x198   : > { %1336 = vrot.lane.b32.xlu1 %v738_v15, %s2437_s10 }
 0x19c   : > { %1334 = vrot.lane.b32.xlu1 %v654_v16, %s2437_s10 }
 0x1fe   : > { %v994_v37 = vpop.permute.xlu1 %993 }
 0x202   : > { %v992_v38 = vpop.permute.xlu1 %991 }
 0x206   : > { %v1164_v39 = vpop.permute.xlu1 %1163 }
 0x20a   : > { %v1337_v42 = vpop.permute.xlu1 %1336 }
 0x20e   : > { %v1335_v43 = vpop.permute.xlu1 %1334 }
 0x24f   : > { %v898_v24 = vpop.f32.mrf.mxu1 }
 0x250   : > { %v902_v25 = vmul.f32 0.35355338, %v898_v24 }
 0x251   : > { %v1952_v26 = vpop.f32.mrf.mxu1 }
 0x252   : > { %v903_v27 = vsel %vm825_vm2, %v902_v25, -inf }
 0x253   : > { %904 = vmax.xlane.f32.xlu0 %v903_v27 }
 0x2dc   : > { %v905_v28 = vpop.xlane.xlu0 %904 }
 0x2dd   : > { %v906_v29 = vsub.f32 %v902_v25, %v905_v28 }
 0x2df   : > { %v907_v30 = vmul.f32 1.442695, %v906_v29 }
 0x2e1   : > { %2112 = vpow2.f32 %v907_v30 }
 0x2ee   : > { %v2113_v31 = vpop.eup %2112 }
 0x2ef   : > { %v909_v32 = vsel %vm825_vm2, %v2113_v31, 0.0 }
 0x2f0   : > { %910 = vadd.xlane.f32.xlu0 %v909_v32 }
 0x306   : > { %1165 = vrot.lane.b32.xlu0 %v738_v15, %s2436_s16 }
 0x379   : > { %v911_v40 = vpop.xlane.xlu0 %910 }
 0x37a   : > { %2114 = vrcp.f32 %v911_v40 }
 0x37d   : > { %v1166_v41 = vpop.permute.xlu0 %1165 }
 0x37e   : > { %1969 = vmatpush3.xpose.msk.msra.mxu0 %vm825_vm2, %v1166_v41 }
 0x37f   : > { %1978 = vmatprep.subr.mxu0 %v2433_v0 }
 0x381   : > { %1971 = vmatmul.mubr.msk.f32.vlgmr.msra.gmra.mxu0 %vm825_vm2, %v1164_v39  ;;  %v1522_v39 = vld [vmem:[#allocation13] sm:$0xff] }
 0x382   : > { %1979 = vmatpush3.xpose.msk.msra.mxu0 %vm825_vm2, %v1337_v42  ;;  %1980 = vmatprep.mubr.msk.f32.mxu0 %vm2434_vm0, %v2433_v0 }
 0x383   : > { %1988 = vmatprep.subr.mxu0 %v2433_v0 }
 0x385   : > { %1981 = vmatmul.mubr.msk.f32.vlgmr.msra.gmra.mxu0 %vm825_vm2, %v1335_v43 }
 0x386   : > { %1996 = vmatprep.mubr.msk.f32.mxu0 %vm2434_vm0, %v2433_v0  ;;  %1989 = vmatpush3.msra.mxu0 %v1525_v36 }
 0x387   : > { %v2115_v44 = vpop.eup %2114  ;;  %1990 = vmatprep.subr.mxu0 %v2433_v0 }
 0x388   : > { %v913_v45 = vmul.f32 %v2115_v44, %v911_v40 }
 0x38a   : > { %v914_v46 = vsub.f32 2.0, %v913_v45 }
 0x38c   : > { %v915_v47 = vmul.f32 %v2115_v44, %v914_v46 }
 0x38e   : > { %v916_v48 = vmul.f32 %v2113_v31, %v915_v47 }
 0x390   : > { %917 = vst.msk [vmem:[%s2818_s17] sm:$0xff] %vm825_vm2, %v916_v48  ;;  %1956 = vmatmul.mubr.msk.f32.vlgmr.msra.gmra.mxu1 %vm825_vm2, %v916_v48 }
 0x391   : > { %1959 = vmatpush3.xpose.msk.msra.mxu1 %vm825_vm2, %v994_v37  ;;  %1960 = vmatprep.mubr.msk.f32.mxu1 %vm2434_vm0, %v2433_v0  ;;  %v1524_v37 = vld [vmem:[#allocation13 + $0x10] sm:$0xff] }
 0x392   : > { %1963 = vmatprep.subr.mxu1 %v2433_v0  ;;  %1991 = vmatpush3.msra.mxu0 %v1524_v37 }
 0x393   : > { %1992 = vmatprep.subr.mxu0 %v2433_v0 }
 0x394   : > { %1961 = vmatmul.mubr.msk.f32.vlgmr.msra.gmra.mxu1 %vm825_vm2, %v992_v38  ;;  %v1523_v38 = vld [vmem:[#allocation13 + $0x8] sm:$0xff] }
 0x395   : > { %1965 = vmatprep.mubr.msk.f32.mxu1 %vm2434_vm0, %v2433_v0  ;;  %1993 = vmatpush3.msra.mxu0 %v1523_v38 }
 0x396   : > { %1994 = vmatprep.subr.mxu0 %v2433_v0 }
 0x397   : > { %1995 = vmatpush3.msra.mxu0 %v1522_v39 }
 0x441   : > { %v1237_v49 = vpop.f32.mrf.mxu0 }
 0x442   : > { %v1241_v50 = vmul.f32 0.35355338, %v1237_v49 }
 0x443   : > { %v1972_v51 = vpop.f32.mrf.mxu0 }
 0x444   : > { %v1242_v52 = vsel %vm825_vm2, %v1241_v50, -inf }
 0x445   : > { %1243 = vmax.xlane.f32.xlu0 %v1242_v52  ;;  %v1408_v53 = vpop.f32.mrf.mxu0 }
 0x446   : > { %v1412_v60 = vmul.f32 0.35355338, %v1408_v53 }
 0x447   : > { %v1982_v54 = vpop.f32.mrf.mxu0 }
 0x448   : > { %v1413_v62 = vsel %vm825_vm2, %v1412_v60, -inf }
 0x450   : > { %v2831_v55 = vpop.f32.mrf.mxu1 }
 0x452   : > { %v1957_v56 = vpop.f32.mrf.mxu1 }
 0x454   : > { %v1065_v57 = vpop.f32.mrf.mxu1 }
 0x455   : > { %v1069_v58 = vmul.f32 0.35355338, %v1065_v57 }
 0x456   : > { %v1962_v59 = vpop.f32.mrf.mxu1 }
 0x457   : > { %v1070_v61 = vsel %vm825_vm2, %v1069_v58, -inf }
 0x458   : > { %1071 = vmax.xlane.f32.xlu1 %v1070_v61 }
 0x45c   : > { %1414 = vmax.xlane.f32.xlu1 %v1413_v62 }
 0x4ce   : > { %v1244_v63 = vpop.xlane.xlu0 %1243 }
 0x4cf   : > { %v1245_v1 = vsub.f32 %v1241_v50, %v1244_v63 }
 0x4d1   : > { %v1246_v2 = vmul.f32 1.442695, %v1245_v1 }
 0x4d3   : > { %2116 = vpow2.f32 %v1246_v2 }
 0x4e0   : > { %v2117_v3 = vpop.eup %2116 }
 0x4e1   : > { %v1072_v4 = vpop.xlane.xlu1 %1071  ;;  %v1248_v5 = vsel %vm825_vm2, %v2117_v3, 0.0 }
 0x4e2   : > { %v1073_v6 = vsub.f32 %v1069_v58, %v1072_v4  ;;  %1249 = vadd.xlane.f32.xlu0 %v1248_v5 }
 0x4e4   : > { %v1074_v7 = vmul.f32 1.442695, %v1073_v6 }
 0x4e5   : > { %v1415_v8 = vpop.xlane.xlu1 %1414 }
 0x4e6   : > { %2118 = vpow2.f32 %v1074_v7  ;;  %v1416_v9 = vsub.f32 %v1412_v60, %v1415_v8 }
 0x4e8   : > { %v1417_v10 = vmul.f32 1.442695, %v1416_v9 }
 0x4ea   : > { %2120 = vpow2.f32 %v1417_v10 }
 0x4f3   : > { %v2119_v11 = vpop.eup %2118 }
 0x4f4   : > { %v1076_v12 = vsel %vm825_vm2, %v2119_v11, 0.0 }
 0x4f5   : > { %1077 = vadd.xlane.f32.xlu1 %v1076_v12 }
 0x4f7   : > { %v2121_v13 = vpop.eup %2120 }
 0x4f8   : > { %1087 = vrot.lane.b32.xlu0 %v2803_v35, %s2435_s3  ;;  %v1419_v14 = vsel %vm825_vm2, %v2121_v13, 0.0  ;;  %s2320_s3 = sshll.u32 %s2441_s18, 4  ;;  %s2321_s3 = int_to_ptr.vmem [resolvable:$false] %s2320_s3 }
 0x4f9   : > { %1420 = vadd.xlane.f32.xlu1 %v1419_v14  ;;  %p2323_p11 = scmp.lt.s32.totalorder %s2873_s21, %s2321_s3 }
 0x50a   : > { %1258 = vrot.lane.b32.xlu1 %v2803_v35, %s2436_s16  ;;  %s2322_s16 = scalar_lea.vmem %s2321_s3, 1024 }
 0x50b   : > { %p2324_p0 = scmp.lt.s32.totalorder %s2322_s16, %s2316_s12 }
 0x50d   : > { %p2325_p4 = por %p2324_p0, %p2323_p11 }
 0x50e   : > { %1429 = vrot.lane.b32.xlu1 %v2803_v35, %s2437_s10 }
 0x50f   : > { %p2326_p7 = pnand %p2325_p4, %p2319_p10 }
 0x56b   : > { %v1250_v15 = vpop.xlane.xlu0 %1249 }
 0x56c   : > { %2122 = vrcp.f32 %v1250_v15 }
 0x56f   : > { %v1088_v16 = vpop.permute.xlu0 %1087 }
 0x570   : > { %1964 = vmatpush3.msra.mxu1 %v1088_v16 }
 0x571   : > { %1973 = vmatprep.subr.mxu1 %v2433_v0 }
 0x579   : > { %v2123_v17 = vpop.eup %2122 }
 0x57a   : > { %v1252_v18 = vmul.f32 %v2123_v17, %v1250_v15 }
 0x57c   : > { %v1253_v19 = vsub.f32 2.0, %v1252_v18 }
 0x57e   : > { %v1254_v20 = vmul.f32 %v2123_v17, %v1253_v19  ;;  %v1078_v21 = vpop.xlane.xlu1 %1077 }
 0x57f   : > { %2124 = vrcp.f32 %v1078_v21 }
 0x580   : > { %v1255_v22 = vmul.f32 %v2117_v3, %v1254_v20 }
 0x582   : > { %1863 = vst.msk [vmem:[%s2818_s17 + $0x10] sm:$0xff] %vm825_vm2, %v1255_v22  ;;  %v1421_v23 = vpop.xlane.xlu1 %1420 }
 0x583   : > { %2126 = vrcp.f32 %v1421_v23 }
 0x586   : > { %v1259_v32 = vpop.permute.xlu1 %1258 }
 0x58a   : > { %v1430_v35 = vpop.permute.xlu1 %1429 }
 0x58c   : > { %v2125_v24 = vpop.eup %2124 }
 0x58d   : > { %v1080_v25 = vmul.f32 %v2125_v24, %v1078_v21 }
 0x58f   : > { %v1081_v26 = vsub.f32 2.0, %v1080_v25 }
 0x590   : > { %v2127_v27 = vpop.eup %2126 }
 0x591   : > { %v1082_v28 = vmul.f32 %v2125_v24, %v1081_v26  ;;  %v1423_v29 = vmul.f32 %v2127_v27, %v1421_v23 }
 0x593   : > { %v1083_v30 = vmul.f32 %v2119_v11, %v1082_v28  ;;  %v1424_v31 = vsub.f32 2.0, %v1423_v29 }
 0x595   : > { %1859 = vst.msk [vmem:[%s2818_s17 + $0x8] sm:$0xff] %vm825_vm2, %v1083_v30  ;;  %v1425_v33 = vmul.f32 %v2127_v27, %v1424_v31  ;;  %1966 = vmatmul.mubr.msk.f32.vlgmr.msra.gmra.mxu1 %vm825_vm2, %v1083_v30 }
 0x596   : > { %1974 = vmatpush3.msra.mxu1 %v1259_v32  ;;  %1975 = vmatprep.mubr.msk.f32.mxu1 %vm2434_vm0, %v2433_v0 }
 0x597   : > { %v1426_v34 = vmul.f32 %v2121_v13, %v1425_v33  ;;  %1983 = vmatprep.subr.mxu1 %v2433_v0 }
 0x599   : > { %1867 = vst.msk [vmem:[%s2818_s17 + $0x18] sm:$0xff] %vm825_vm2, %v1426_v34  ;;  %1976 = vmatmul.mubr.msk.f32.vlgmr.msra.gmra.mxu1 %vm825_vm2, %v1255_v22 }
 0x59a   : > { %1984 = vmatpush3.msra.mxu1 %v1430_v35  ;;  %1985 = vmatprep.mubr.msk.f32.mxu1 %vm2434_vm0, %v2433_v0 }
 0x59d   : > { %1986 = vmatmul.mubr.msk.f32.vlgmr.msra.gmra.mxu1 %vm825_vm2, %v1426_v34 }
 0x655   : > { %v1159_v40 = vpop.f32.mrf.mxu1 }
 0x656   : > { %1506 = vrot.lane.b32.xlu0 %v1159_v40, %s2438_s30 }
 0x657   : > { %v1967_v41 = vpop.f32.mrf.mxu1 }
 0x659   : > { %v1330_v42 = vpop.f32.mrf.mxu1 }
 0x65a   : > { %1510 = vrot.lane.b32.xlu1 %v1330_v42, %s2439_s29 }
 0x65b   : > { %v1977_v43 = vpop.f32.mrf.mxu1 }
 0x65d   : > { %v1501_v44 = vpop.f32.mrf.mxu1 }
 0x65e   : > { %1514 = vrot.lane.b32.xlu0 %v1501_v44, %s2440_s26 }
 0x65f   : > { %v1987_v45 = vpop.f32.mrf.mxu1 }
 0x6c8   : > { %v1507_v46 = vpop.permute.xlu0 %1506 }
 0x6c9   : > { %v1517_v47 = vsel %vm825_vm2, %v2831_v55, %v1507_v46 }
 0x6cc   : > { %v1511_v0 = vpop.permute.xlu1 %1510 }
 0x6cd   : > { %v1519_v48 = vsel %vm1518_vm3, %v1517_v47, %v1511_v0 }
 0x6d0   : > { %v1515_v49 = vpop.permute.xlu0 %1514 }
 0x6d1   : > { %v1521_v50 = vsel %vm1520_vm4, %v1519_v48, %v1515_v49 }
 0x6d2   : > { %1997 = vmatmul.mubr.msk.f32.vlgmr.msra.gmra.mxu0 %vm583_vm1, %v1521_v50 }
 0x6d3   : > { %2329 = shalt.err (!%p2326_p7)
}
 0x6d4   : > { %s2330_s10 = scalar_lea.hbm %s2871_s19, 512  ;;  %s2334_s14 = scalar_lea.hbm %s3015_s25, 1024 }
 0x6d5   : > { %p2331_p3 = scmp.ne.s32.totalorder %s2871_s19, %s2330_s10  ;;  %p2335_p6 = scmp.lt.s32.totalorder %s2871_s19, %s3015_s25 }
 0x6d6   : > { %p2336_p9 = scmp.lt.s32.totalorder %s2334_s14, %s2330_s10 }
 0x6d7   : > { %p2332_p12 = pnand %p2331_p3, %p3016_p1 }
 0x6d8   : > { %p2337_p2 = por %p2336_p9, %p2335_p6 }
 0x6d9   : > { %p2333_p13 = pneg %p2332_p12 }
 0x6db   : > { %p2338_p5 = pnand %p2337_p2, %p2333_p13 }
 0x6dd   : > { %2341 = shalt.err (!%p2338_p5)
}
 0x6de   : > { %s2442_s26 = smov 128   ;;  %s3017_s15 = sld [smem:[#allocation32_spill]] }
 0x6df   : > { %2022 = dma.vmem_to_hbm [thread:$0]  (%p3016_p1), %s2873_s21, 512, %s2871_s19, %s1613_s11, %s2442_s26, %s2442_s26, %s2438_s30  }
 0x6e0   : > { %s1873_s12 = sshll.u32 %s2530_s27, 7  ;;  %s561_s18 = scalar_lea.vmem [#allocation14], %s2725_s24 }
 0x6e1   : > { %s1626_s3 = sshll.u32 %s561_s18, 4  ;;  %s3018_s13 = sld [smem:[#allocation33_spill]]  ;;  %s1627_s3 = int_to_ptr.vmem [resolvable:$true] %s1626_s3 }
 0x6e2   : > { %s1608_s14 = scalar_lea.sflag [#allocation4], %s2722_s0  ;;  %s2342_s30 = scalar_lea.vmem %s1627_s3, 128 }
 0x6e3   : > { %p2343_p8 = scmp.ne.s32.totalorder %s1627_s3, %s2342_s30  ;;  %s2443_s27 = smov [#allocation14]  }
 0x6e4   : > { %v1869_v51 = vld [vmem:[%s3017_s15] ss:$0 sm:$0xff]  ;;  %s2346_s24 = sshll.u32 %s2443_s27, 4  ;;  %s2347_s24 = int_to_ptr.vmem [resolvable:$false] %s2346_s24 }
 0x6e5   : > { %p2344_p10 = pnand %p2343_p8, %p3016_p1  ;;  %s2348_s21 = scalar_lea.vmem %s2347_s24, 256 }
 0x6e6   : > { %p2349_p0 = scmp.lt.s32.totalorder %s1627_s3, %s2347_s24  ;;  %p2350_p4 = scmp.lt.s32.totalorder %s2348_s21, %s2342_s30 }
 0x6e7   : > { %s2907_s7 = scalar_lea.hbm %s3018_s13, %s1873_s12  ;;  %p2345_p11 = pneg %p2344_p10 }
 0x6e8   : > { %p2351_p7 = por %p2350_p4, %p2349_p0 }
 0x6ea   : > { %p2352_p3 = pnand %p2351_p7, %p2345_p11 }
 0x792   : > { %v1602_v52 = vpop.f32.mrf.mxu0 }
 0x793   : > { %v1603_v53 = vadd.f32 %v1869_v51, %v1602_v52 }
 0x794   : > { %v1998_v54 = vpop.f32.mrf.mxu0 }
 0x795   : > { %1606 = vst.msk [vmem:[%s561_s18] sm:$0xff] %vm583_vm1, %v1603_v53 }
 0x796   : > { %2355 = shalt.err (!%p2352_p3)
}
 0x797   : > { %s2356_s19 = scalar_lea.hbm %s2907_s7, 128  ;;  %s2360_s17 = scalar_lea.hbm %s3018_s13, 256 }
 0x798   : > { %p2357_p12 = scmp.ne.s32.totalorder %s2907_s7, %s2356_s19  ;;  %p2361_p9 = scmp.lt.s32.totalorder %s2907_s7, %s3018_s13 }
 0x799   : > { %p2362_p2 = scmp.lt.s32.totalorder %s2360_s17, %s2356_s19 }
 0x79a   : > { %p2358_p13 = pnand %p2357_p12, %p3016_p1 }
 0x79b   : > { %p2363_p5 = por %p2362_p2, %p2361_p9 }
 0x79c   : > { %p2359_p6 = pneg %p2358_p13 }
 0x79e   : > { %p2364_p8 = pnand %p2363_p5, %p2359_p6 }
 0x7a0   : > { %2367 = shalt.err (!%p2364_p8)
}
 0x7a1   : > { %2021 = dma.vmem_to_hbm [thread:$0]  (%p3016_p1), %s1627_s3, 128, %s2907_s7, %s1608_s14  }
 0x7a2 PF: > { %s3019_s1 = sld [smem:[#allocation23_spill]] }
 0x7a3   : > { %s3020_s28 = sld [smem:[#allocation27_spill]] }
 0x7a4   : > { %s3021_s15 = sld [smem:[#allocation24_spill]] }
 0x7a8   : > { %s1654_s12 = sand.u32 1, %s3019_s1  }
 0x7a9   : > { %p3022_p10 = scmp.ne.s32.totalorder %s3020_s28, 0  ;;  %s1655_s18 = scalar_lea.sflag [#allocation4], %s1654_s12 }
 0x7aa   : > { %p3023_p11 = scmp.ge.s32.totalorder %s3021_s15, 2 }
 0x7ac   : > { %p2049_p0 = pnand %p3023_p11, %p3022_p10 }
 0x7ae   : > { %p2050_p4 = pneg %p2049_p0 }
 0x7b0   : > { %2401 = dma.done.wait (%p2050_p4), %s1655_s18, 128  }
 0x7b1   : > { %2403 = vsyncadd (%p2050_p4), %s1655_s18, 4294967168  ;;  %s1664_s16 = scalar_lea.sflag [#allocation16], %s1654_s12 }
 0x7b2   : > { %2405 = dma.done.wait (%p2050_p4), %s1664_s16, 512  }
 0x7b3   : > { %2407 = vsyncadd (%p2050_p4), %s1664_s16, 4294966784  ;;  %s3024_s24 = sld [smem:[#allocation25_spill]]  ;;  %s3026_s21 = smov %s2414_s22 }
 0x7b4   : > { %s3025_s20 = sld [smem:[#allocation26_spill]]  ;;  %s3027_s22 = smov %s2418_s23 }
 0x7b9   : > { %p34_p1 = scmp.ge.s32.totalorder %s3024_s24, 4  }
 0x7ba   : > { %s3028_s23 = smov %s3025_s20 }
 0x7bb   :  { %36 = sbr.rel (!%p34_p1) target bundleno = 19 (0x13), region = 169 }
 0x7c0   :  { %1669 = vsyncpa [#allocation3], 1 }
 0x7c1   :  { %1671 = vsyncpa [#allocation3 + $0x1], 1 }
 0x7c2   :  { %1672 = vsyncpa [#allocation6], 1 }
 0x7c3   :  { %1674 = vsyncpa [#allocation6 + $0x1], 1 }
 0x7c4   :  { %1675 = vsyncpa [#allocation9], 1 }
 0x7c5   :  { %1676 = vsyncpa [#allocation12], 1 }
 0x7c6   :  { %1677 = vsyncpa [#allocation4], 1 }
 0x7c7   :  { %1679 = vsyncpa [#allocation4 + $0x1], 1 }
 0x7c8   :  { %1680 = vsyncpa [#allocation16], 1 }
 0x7c9   :  { %1682 = vsyncpa [#allocation16 + $0x1], 1 }

</bundles_post_ra>
